<compile_context>
chip_gen: v5e
topology: v5e:2x2
jax: 0.10.0
libtpu: 0.0.40
codegen_flags: <defaults>
</compile_context>

<pallas_src>
import functools

import jax
import jax.numpy as jnp
import numpy as np
from jax.experimental import pallas as pl
from jax.experimental.pallas import tpu as pltpu


def _round_up(x, m):
    return ((x + m - 1) // m) * m


def _fm_kernel(emb_ref, lin_ref, bias_ref, out_ref, *, num_fields, embed_dim):
    # emb_ref : (TB, F*D) bf16  gathered embeddings, lane-dense flattened slab
    # lin_ref : (TB, F)   f32   gathered linear weights
    # bias_ref: (1, 1)    f32   scalar in SMEM
    # out_ref : (TB, 1)   f32
    e = emb_ref[...].astype(jnp.float32)            # single upcast; all math in f32
    d = embed_dim

    # FM interaction: s = sum_f e_f ; sq = sum_f e_f^2 (static lane slices of the slab)
    e0 = e[:, 0:d]
    s = e0
    sq = e0 * e0
    for f in range(1, num_fields):
        ef = e[:, f * d:(f + 1) * d]
        s = s + ef
        sq = sq + ef * ef
    fm = 0.5 * jnp.sum(s * s - sq, axis=1, keepdims=True)       # (TB, 1)

    # Linear term + bias.
    lin = jnp.sum(lin_ref[...], axis=1, keepdims=True)          # (TB, 1)
    z = lin + fm + bias_ref[0, 0]

    out_ref[...] = 1.0 / (1.0 + jnp.exp(-z))                    # sigmoid in f32


def fm_forward_pallas(x, embed_table, linear_table, bias, field_offsets, *, tile_b=512):
    """x: (B, F) int32 indices; returns (B,) f32 predictions."""
    B, F = x.shape
    D = embed_table.shape[1]

    idx = x + field_offsets[None, :]                            # (B, F)

    # Glue: row gathers (pure index lookups). Embeddings are stored/moved as bf16
    # to halve HBM traffic of the dominant stream; math stays f32 inside the kernel.
    tbl_bf16 = embed_table.astype(jnp.bfloat16)
    emb = jnp.take(tbl_bf16, idx, axis=0).reshape(B, F * D)     # (B, F*D) bf16, free reshape
    lin = jnp.take(linear_table[:, 0], idx, axis=0)             # (B, F)  f32
    bias2d = jnp.reshape(bias, (1, 1)).astype(jnp.float32)

    # Batch tiling: tile_b rows per grid step (multiple of 128 lanes / sublane tiles).
    tb = min(int(tile_b), _round_up(B, 128))
    assert tb % 128 == 0, "tile_b must be a multiple of 128"
    b_pad = _round_up(B, tb)
    if b_pad != B:
        emb = jnp.pad(emb, ((0, b_pad - B), (0, 0)))
        lin = jnp.pad(lin, ((0, b_pad - B), (0, 0)))

    kernel = functools.partial(_fm_kernel, num_fields=F, embed_dim=D)

    out = pl.pallas_call(
        kernel,
        out_shape=jax.ShapeDtypeStruct((b_pad, 1), jnp.float32),
        grid=(b_pad // tb,),
        in_specs=[
            pl.BlockSpec((tb, F * D), lambda i: (i, 0)),                 # emb slab (bf16)
            pl.BlockSpec((tb, F), lambda i: (i, 0)),                     # linear weights
            pl.BlockSpec((1, 1), lambda i: (0, 0),
                         memory_space=pltpu.MemorySpace.SMEM),           # bias scalar
        ],
        out_specs=pl.BlockSpec((tb, 1), lambda i: (i, 0)),
        compiler_params=pltpu.CompilerParams(
            dimension_semantics=("parallel",),                           # megacore on v7x
        ),
    )(emb, lin.astype(jnp.float32), bias2d)

    return out[:B, 0]                                            # squeeze(1) -> (B,)


def fm_forward_ref(x, embed_table, linear_table, bias, field_offsets,
                   storage_dtype=jnp.bfloat16):
    """Pure-JAX reference (storage_dtype models the embedding storage precision)."""
    idx = x + field_offsets[None, :]
    e = jnp.take(embed_table.astype(storage_dtype), idx, axis=0).astype(jnp.float32)
    lin = jnp.sum(jnp.take(linear_table, idx, axis=0)[..., 0], axis=1, keepdims=True) + bias
    s = jnp.sum(e, axis=1)
    sq = jnp.sum(e * e, axis=1)
    fm = 0.5 * jnp.sum(s * s - sq, axis=-1, keepdims=True)
    return jax.nn.sigmoid((lin + fm)[:, 0])


if __name__ == "__main__":
    # Small, deterministic synthetic setup consistent with the module.
    field_dims = (3, 4, 5, 6)            # per-field vocabulary sizes
    num_features = int(np.sum(field_dims))
    F = len(field_dims)
    D = 32                               # embed_dim
    B = 200                              # batch (not a multiple of 128 -> exercises padding)

    key = jax.random.PRNGKey(0)
    k_emb, k_lin, k_x = jax.random.split(key, 3)

    embed_table = 0.1 * jax.random.normal(k_emb, (num_features, D), dtype=jnp.float32)
    linear_table = 0.01 * jax.random.normal(k_lin, (num_features, 1), dtype=jnp.float32)
    bias = jnp.zeros((1,), dtype=jnp.float32)

    field_offsets = jnp.asarray(
        np.concatenate(([0], np.cumsum(field_dims)[:-1])), dtype=jnp.int32
    )

    maxvals = jnp.asarray(field_dims, dtype=jnp.int32)
    u = jax.random.uniform(k_x, (B, F))
    x = jnp.floor(u * maxvals[None, :].astype(jnp.float32)).astype(jnp.int32)
    x = jnp.clip(x, 0, maxvals[None, :] - 1)

    # tile_b=128 -> padded batch 256, grid of 2 parallel steps.
    out = fm_forward_pallas(x, embed_table, linear_table, bias, field_offsets, tile_b=128)
    out = jax.block_until_ready(out)
    assert out.shape == (B,)

    # Tight check against a reference with the same bf16 embedding storage.
    ref_bf16 = fm_forward_ref(x, embed_table, linear_table, bias, field_offsets,
                              storage_dtype=jnp.bfloat16)
    np.testing.assert_allclose(np.asarray(out), np.asarray(ref_bf16), rtol=1e-5, atol=1e-5)

    # Loose sanity check against the original full-f32 module semantics.
    ref_f32 = fm_forward_ref(x, embed_table, linear_table, bias, field_offsets,
                             storage_dtype=jnp.float32)
    np.testing.assert_allclose(np.asarray(out), np.asarray(ref_f32), rtol=1e-2, atol=1e-2)

    print("KERNEL_OK")
</pallas_src>

<mosaic_0001>
module attributes {stable_mosaic.version = 11 : i64} {
  func.func @_fm_kernel(%arg0: i32, %arg1: memref<128x128xbf16, #tpu.memory_space<vmem>>, %arg2: memref<128x4xf32, #tpu.memory_space<vmem>>, %arg3: memref<1x1xf32, #tpu.memory_space<smem>>, %arg4: memref<128x1xf32, #tpu.memory_space<vmem>>) attributes {dimension_semantics = [#tpu.dimension_semantics<parallel>], iteration_bounds = array<i64: 2>, scalar_prefetch = 0 : i64, scratch_operands = 0 : i64, tpu.core_type = #tpu.core_type<tc>, window_params = [{transform_indices = @transform_0, window_bounds = array<i64: 128, 128>}, {transform_indices = @transform_1, window_bounds = array<i64: 128, 4>}, {transform_indices = @transform_2, window_bounds = array<i64: 1, 1>}, {transform_indices = @transform_3, window_bounds = array<i64: 128, 1>}]} {
    %c0 = arith.constant 0 : index
    %c0_0 = arith.constant 0 : index
    %0 = vector.load %arg1[%c0, %c0_0] : memref<128x128xbf16, #tpu.memory_space<vmem>>, vector<128x128xbf16>
    %1 = arith.extf %0 : vector<128x128xbf16> to vector<128x128xf32>
    %2 = vector.extract_strided_slice %1 {offsets = [0, 0], sizes = [128, 32], strides = [1, 1]} : vector<128x128xf32> to vector<128x32xf32>
    %3 = arith.mulf %2, %2 : vector<128x32xf32>
    %4 = vector.extract_strided_slice %1 {offsets = [0, 32], sizes = [128, 32], strides = [1, 1]} : vector<128x128xf32> to vector<128x32xf32>
    %5 = arith.addf %2, %4 : vector<128x32xf32>
    %6 = arith.mulf %4, %4 : vector<128x32xf32>
    %7 = arith.addf %3, %6 : vector<128x32xf32>
    %8 = vector.extract_strided_slice %1 {offsets = [0, 64], sizes = [128, 32], strides = [1, 1]} : vector<128x128xf32> to vector<128x32xf32>
    %9 = arith.addf %5, %8 : vector<128x32xf32>
    %10 = arith.mulf %8, %8 : vector<128x32xf32>
    %11 = arith.addf %7, %10 : vector<128x32xf32>
    %12 = vector.extract_strided_slice %1 {offsets = [0, 96], sizes = [128, 32], strides = [1, 1]} : vector<128x128xf32> to vector<128x32xf32>
    %13 = arith.addf %9, %12 : vector<128x32xf32>
    %14 = arith.mulf %12, %12 : vector<128x32xf32>
    %15 = arith.addf %11, %14 : vector<128x32xf32>
    %16 = arith.mulf %13, %13 : vector<128x32xf32>
    %17 = arith.subf %16, %15 : vector<128x32xf32>
    %cst = arith.constant dense<0.000000e+00> : vector<128xf32>
    %18 = vector.multi_reduction <add>, %17, %cst [1] : vector<128x32xf32> to vector<128xf32>
    %19 = vector.shape_cast %18 : vector<128xf32> to vector<128x1xf32>
    %cst_1 = arith.constant 5.000000e-01 : f32
    %20 = vector.broadcast %cst_1 : f32 to vector<128x1xf32>
    %21 = arith.mulf %20, %19 : vector<128x1xf32>
    %c0_2 = arith.constant 0 : index
    %c0_3 = arith.constant 0 : index
    %22 = vector.load %arg2[%c0_2, %c0_3] : memref<128x4xf32, #tpu.memory_space<vmem>>, vector<128x4xf32>
    %cst_4 = arith.constant dense<0.000000e+00> : vector<128xf32>
    %23 = vector.multi_reduction <add>, %22, %cst_4 [1] : vector<128x4xf32> to vector<128xf32>
    %24 = vector.shape_cast %23 : vector<128xf32> to vector<128x1xf32>
    %25 = arith.addf %24, %21 : vector<128x1xf32>
    %c0_5 = arith.constant 0 : index
    %c0_6 = arith.constant 0 : index
    %26 = memref.load %arg3[%c0_5, %c0_6] : memref<1x1xf32, #tpu.memory_space<smem>>
    %27 = vector.broadcast %26 : f32 to vector<128x1xf32>
    %28 = arith.addf %25, %27 : vector<128x1xf32>
    %cst_7 = arith.constant 0.000000e+00 : f32
    %29 = vector.broadcast %cst_7 : f32 to vector<128x1xf32>
    %30 = arith.subf %29, %28 : vector<128x1xf32>
    %31 = math.exp %30 : vector<128x1xf32>
    %cst_8 = arith.constant 1.000000e+00 : f32
    %32 = vector.broadcast %cst_8 : f32 to vector<128x1xf32>
    %33 = arith.addf %32, %31 : vector<128x1xf32>
    %cst_9 = arith.constant 1.000000e+00 : f32
    %34 = vector.broadcast %cst_9 : f32 to vector<128x1xf32>
    %35 = arith.divf %34, %33 : vector<128x1xf32>
    %c0_10 = arith.constant 0 : index
    %c0_11 = arith.constant 0 : index
    %36 = vector.load %arg4[%c0_10, %c0_11] : memref<128x1xf32, #tpu.memory_space<vmem>>, vector<128x1xf32>
    tpu.vector_store %arg4[%c0_10, %c0_11], %35 {strides = array<i32>} : memref<128x1xf32, #tpu.memory_space<vmem>>, vector<128x1xf32>,
    return
  }
  func.func @transform_0(%arg0: i32) -> (i32, i32) {
    %c0_i32 = arith.constant 0 : i32
    %c0_i32_0 = arith.constant 0 : i32
    return %arg0, %c0_i32 : i32, i32
  }
  func.func @transform_1(%arg0: i32) -> (i32, i32) {
    %c0_i32 = arith.constant 0 : i32
    %c0_i32_0 = arith.constant 0 : i32
    return %arg0, %c0_i32 : i32, i32
  }
  func.func @transform_2(%arg0: i32) -> (i32, i32) {
    %c0_i32 = arith.constant 0 : i32
    %c0_i32_0 = arith.constant 0 : i32
    %c0_i32_1 = arith.constant 0 : i32
    return %c0_i32, %c0_i32_0 : i32, i32
  }
  func.func @transform_3(%arg0: i32) -> (i32, i32) {
    %c0_i32 = arith.constant 0 : i32
    %c0_i32_0 = arith.constant 0 : i32
    return %arg0, %c0_i32 : i32, i32
  }
}

</mosaic_0001>

<bundles_post_ra>
// kernel: tpu_custom_call.1
= control target key start
LH: loop header
LB: loop body
LE: loop exit
PB: predicated region body
PF: predicated region fallthrough
CT: control target
= control target key end

     0   :  { %s1527_s14 = smov 0   ;;  %s2372_s0 = inlined_call_operand.vmem [shape: bf16[256,128], index: 0, kind: input, shape index: {}]   ;;  %s2373_s1 = inlined_call_operand.vmem [shape: f32[256,4], index: 1, kind: input, shape index: {}]   ;;  %s2374_s2 = inlined_call_operand.<no memory space> [shape: f32[1,1], index: 2, kind: input, shape index: {}]   ;;  %s2375_s3 = inlined_call_operand.vmem [shape: f32[256,1], index: 3, kind: output, shape index: {}]  }
   0x1   :  { %8 = sst [smem:[#allocation2]] %s2374_s2 }
   0x2 LB: > { %s1246_s15 = sadd.s32 4294967295, %s1499_s14   ;;  %p1250_p0 = scmp.ge.s32.totalorder %s1499_s14, 1  ;;  %s1499_s14 = sphi %s1527_s14, %s14_s14  }
   0x3   : > { %p150_p1 = scmp.lt.s32.totalorder %s1499_s14, 3 }
   0x5   : > { %p151_p2 = pnand %p1250_p0, %p150_p1 }
   0x7   : > { %154 = sbr.rel (%p151_p2) target bundleno = 549 (0x225), region = 32 }
   0xc   : > { %s1251_s16 = sshll.u32 %s1246_s15, 4  ;;  %s1501_s20 = smov 96   ;;  %vm693_vm0 = vcmask 261120   ;;  %vm774_vm1 = vcmask 31744   ;;  %vm1161_vm2 = vcmask 7168  }
   0xd   : > { %p180_p3 = scmp.lt.s32.totalorder %s1251_s16, 31  ;;  %s1502_s21 = smov 64  }
   0xe   : > { %s1503_s22 = smov 32   ;;  %s839_s27 = sld [smem:[#allocation2]] }
   0xf   : > { %s2417_s16 = smov (!%p180_p3, %s1251_s16), 31 }
  0x10   : > { %s1252_s2 = sshll.u32 %s2417_s16, 2  ;;  %s1254_s23 = sshll.u32 %s2417_s16, 3 }
  0x11   : > { %s183_s19 = scalar_lea.vmem %s2372_s0, %s1252_s2  ;;  %s2076_s26 = scalar_lea.vmem %s2373_s1, %s1254_s23 }
  0x12   : > { %v1294_v0 = vld [vmem:[%s183_s19 + $0x20] sm:$0xff]   ;;  %v1292_v1 = vld [vmem:[%s183_s19 + $0x10] sm:$0xff]   ;;  %v1295_v9 = vld [vmem:[%s183_s19 + $0x28] sm:$0xff]   ;;  %s2185_s30 = scalar_lea.vmem %s2375_s3, %s1254_s23 }
  0x13   : > { %v1260_v2 = vld [vmem:[%s183_s19] sm:$0xff]   ;;  %v1541_v3 = vunpack.c.l.bf16 %v1294_v0  ;;  %v1543_v4 = vunpack.c.h.bf16 %v1294_v0  ;;  %v1545_v5 = vunpack.c.l.bf16 %v1292_v1  ;;  %v1547_v6 = vunpack.c.h.bf16 %v1292_v1  ;;  %v1293_v10 = vld [vmem:[%s183_s19 + $0x18] sm:$0xff]   ;;  %v1291_v13 = vld [vmem:[%s183_s19 + $0x8] sm:$0xff]  }
  0x14   : > { %v1549_v7 = vunpack.c.l.bf16 %v1260_v2  ;;  %v1551_v8 = vunpack.c.h.bf16 %v1260_v2  ;;  %v1569_v15 = vunpack.c.l.bf16 %v1295_v9  ;;  %v1571_v16 = vunpack.c.h.bf16 %v1295_v9  ;;  %v1297_v24 = vld [vmem:[%s183_s19 + $0x38] sm:$0xff]   ;;  %v1296_v25 = vld [vmem:[%s183_s19 + $0x30] sm:$0xff]  }
  0x15   : > { %v1555_v11 = vpack.i.bf16 %v1543_v4, %v1541_v3  ;;  %v1559_v12 = vpack.i.bf16 %v1547_v6, %v1545_v5  ;;  %v1573_v17 = vunpack.c.l.bf16 %v1293_v10  ;;  %v1575_v18 = vunpack.c.h.bf16 %v1293_v10 }
  0x16   : > { %v1563_v14 = vpack.i.bf16 %v1551_v8, %v1549_v7  ;;  %v1579_v19 = vunpack.c.l.bf16 %v1291_v13  ;;  %v1581_v20 = vunpack.c.h.bf16 %v1291_v13  ;;  %v1585_v21 = vpack.i.bf16 %v1571_v16, %v1569_v15 }
  0x17   : > { %1330 = vrot.lane.b32.xlu2 %v1555_v11, %s1501_s20  ;;  %1320 = vrot.lane.b32.xlu1 %v1559_v12, %s1501_s20  ;;  %v1589_v22 = vpack.i.bf16 %v1575_v18, %v1573_v17  ;;  %v1599_v26 = vunpack.c.l.bf16 %v1297_v24  ;;  %v1601_v27 = vunpack.c.h.bf16 %v1297_v24  ;;  %v1605_v28 = vunpack.c.l.bf16 %v1296_v25 }
  0x18   : > { %1310 = vrot.lane.b32.xlu0 %v1563_v14, %s1501_s20  ;;  %v1593_v23 = vpack.i.bf16 %v1581_v20, %v1579_v19  ;;  %v1607_v29 = vunpack.c.h.bf16 %v1296_v25  ;;  %v1615_v31 = vmul.f32 %v1549_v7, %v1549_v7  ;;  %v1629_v33 = vmul.f32 %v1579_v19, %v1579_v19 }
  0x19   : > { %v1611_v30 = vpack.i.bf16 %v1601_v27, %v1599_v26  ;;  %v1633_v34 = vmul.f32 %v1581_v20, %v1581_v20  ;;  %v1637_v35 = vmul.f32 %v1551_v8, %v1551_v8  ;;  %v1647_v36 = vmul.f32 %v1547_v6, %v1547_v6 }
  0x1a   : > { %v1619_v32 = vpack.i.bf16 %v1607_v29, %v1605_v28  ;;  %v1651_v37 = vmul.f32 %v1573_v17, %v1573_v17  ;;  %v1655_v38 = vmul.f32 %v1545_v5, %v1545_v5  ;;  %v1665_v39 = vmul.f32 %v1541_v3, %v1541_v3 }
  0x1b   : > { %v1669_v40 = vmul.f32 %v1543_v4, %v1543_v4  ;;  %v1673_v41 = vmul.f32 %v1575_v18, %v1575_v18  ;;  %v1683_v42 = vmul.f32 %v1571_v16, %v1571_v16  ;;  %v1687_v43 = vmul.f32 %v1605_v28, %v1605_v28 }
  0x1c   : > { %v1691_v44 = vmul.f32 %v1569_v15, %v1569_v15  ;;  %v1701_v45 = vmul.f32 %v1599_v26, %v1599_v26  ;;  %v1705_v46 = vmul.f32 %v1601_v27, %v1601_v27  ;;  %v1709_v47 = vmul.f32 %v1607_v29, %v1607_v29 }
  0x1e   : > { %2378 = vst [vmem:[#allocation3_spill] sm:$0xff] %v1701_v45 }
  0x1f   : > { %1335 = vrot.lane.b32.xlu2 %v1585_v21, %s1501_s20  ;;  %1325 = vrot.lane.b32.xlu1 %v1589_v22, %s1501_s20  ;;  %2379 = vst [vmem:[#allocation4_spill] sm:$0xff] %v1709_v47 }
  0x20   : > { %1315 = vrot.lane.b32.xlu0 %v1593_v23, %s1501_s20 }
  0x27   : > { %1345 = vrot.lane.b32.xlu1 %v1611_v30, %s1501_s20  ;;  %341 = vrot.lane.b32.xlu2 %v1615_v31, %s1501_s20 }
  0x28   : > { %1340 = vrot.lane.b32.xlu0 %v1619_v32, %s1501_s20 }
  0x2f   : > { %345 = vrot.lane.b32.xlu1 %v1629_v33, %s1501_s20  ;;  %347 = vrot.lane.b32.xlu2 %v1633_v34, %s1501_s20 }
  0x30   : > { %343 = vrot.lane.b32.xlu0 %v1637_v35, %s1501_s20 }
  0x37   : > { %351 = vrot.lane.b32.xlu1 %v1647_v36, %s1501_s20  ;;  %353 = vrot.lane.b32.xlu2 %v1651_v37, %s1501_s20 }
  0x38   : > { %349 = vrot.lane.b32.xlu0 %v1655_v38, %s1501_s20 }
  0x3f   : > { %357 = vrot.lane.b32.xlu1 %v1665_v39, %s1501_s20  ;;  %359 = vrot.lane.b32.xlu2 %v1669_v40, %s1501_s20 }
  0x40   : > { %355 = vrot.lane.b32.xlu0 %v1673_v41, %s1501_s20 }
  0x47   : > { %363 = vrot.lane.b32.xlu1 %v1683_v42, %s1501_s20  ;;  %365 = vrot.lane.b32.xlu2 %v1687_v43, %s1501_s20 }
  0x48   : > { %361 = vrot.lane.b32.xlu0 %v1691_v44, %s1501_s20 }
  0x4f   : > { %369 = vrot.lane.b32.xlu1 %v1701_v45, %s1501_s20  ;;  %371 = vrot.lane.b32.xlu2 %v1705_v46, %s1501_s20 }
  0x50   : > { %367 = vrot.lane.b32.xlu0 %v1709_v47, %s1501_s20 }
  0x57   : > { %1355 = vrot.lane.b32.xlu1 %v1593_v23, %s1502_s21  ;;  %1360 = vrot.lane.b32.xlu2 %v1559_v12, %s1502_s21 }
  0x58   : > { %1350 = vrot.lane.b32.xlu0 %v1563_v14, %s1502_s21 }
  0x5f   : > { %1370 = vrot.lane.b32.xlu1 %v1555_v11, %s1502_s21  ;;  %1375 = vrot.lane.b32.xlu2 %v1585_v21, %s1502_s21 }
  0x60   : > { %1365 = vrot.lane.b32.xlu0 %v1589_v22, %s1502_s21 }
  0x67   : > { %1385 = vrot.lane.b32.xlu1 %v1611_v30, %s1502_s21  ;;  %469 = vrot.lane.b32.xlu2 %v1615_v31, %s1502_s21 }
  0x68   : > { %1380 = vrot.lane.b32.xlu0 %v1619_v32, %s1502_s21 }
  0x6f   : > { %473 = vrot.lane.b32.xlu1 %v1629_v33, %s1502_s21  ;;  %475 = vrot.lane.b32.xlu2 %v1633_v34, %s1502_s21 }
  0x70   : > { %471 = vrot.lane.b32.xlu0 %v1637_v35, %s1502_s21 }
  0x71   : > { %v1729_v48 = vpop.permute.xlu2 %1330 }
  0x77   : > { %479 = vrot.lane.b32.xlu1 %v1647_v36, %s1502_s21  ;;  %481 = vrot.lane.b32.xlu2 %v1651_v37, %s1502_s21 }
  0x78   : > { %477 = vrot.lane.b32.xlu0 %v1655_v38, %s1502_s21 }
  0x79   : > { %v1336_v49 = vpop.permute.xlu2 %1335 }
  0x7a   : > { %v1338_v25 = vunpack.i.h.bf16 %v1336_v49 }
  0x7f   : > { %485 = vrot.lane.b32.xlu1 %v1665_v39, %s1502_s21  ;;  %487 = vrot.lane.b32.xlu2 %v1669_v40, %s1502_s21 }
  0x80   : > { %483 = vrot.lane.b32.xlu0 %v1673_v41, %s1502_s21 }
  0x81   : > { %v1737_v50 = vpop.permute.xlu2 %341 }
  0x87   : > { %491 = vrot.lane.b32.xlu1 %v1683_v42, %s1502_s21  ;;  %493 = vrot.lane.b32.xlu2 %v1687_v43, %s1502_s21 }
  0x88   : > { %489 = vrot.lane.b32.xlu0 %v1691_v44, %s1502_s21 }
  0x89   : > { %v1321_v51 = vpop.permute.xlu1 %1320  ;;  %v1742_v52 = vpop.permute.xlu2 %347 }
  0x8a   : > { %v1744_v53 = vpop.permute.xlu0 %1310  ;;  %v1323_v2 = vunpack.i.h.bf16 %v1321_v51  ;;  %v1322_v9 = vunpack.i.l.bf16 %v1321_v51 }
  0x8c   : > { %v313_v13 = vadd.f32 %v1322_v9, %v1545_v5 }
  0x8f   : > { %497 = vrot.lane.b32.xlu1 %v1701_v45, %s1502_s21  ;;  %499 = vrot.lane.b32.xlu2 %v1705_v46, %s1502_s21 }
  0x90   : > { %495 = vrot.lane.b32.xlu0 %v1709_v47, %s1502_s21 }
  0x91   : > { %v1749_v54 = vpop.permute.xlu1 %1325  ;;  %v1751_v55 = vpop.permute.xlu2 %353 }
  0x92   : > { %v1753_v56 = vpop.permute.xlu0 %1315 }
  0x97   : > { %1395 = vrot.lane.b32.xlu1 %v1593_v23, %s1503_s22  ;;  %1400 = vrot.lane.b32.xlu2 %v1559_v12, %s1503_s22  ;;  %v314_v12 = vadd.f32 %v1323_v2, %v1547_v6 }
  0x98   : > { %1390 = vrot.lane.b32.xlu0 %v1563_v14, %s1503_s22 }
  0x99   : > { %v1761_v57 = vpop.permute.xlu1 %1345  ;;  %v1763_v58 = vpop.permute.xlu2 %359 }
  0x9a   : > { %v1765_v59 = vpop.permute.xlu0 %1340 }
  0x9f   : > { %1410 = vrot.lane.b32.xlu1 %v1555_v11, %s1503_s22  ;;  %1415 = vrot.lane.b32.xlu2 %v1585_v21, %s1503_s22 }
  0xa0   : > { %1405 = vrot.lane.b32.xlu0 %v1589_v22, %s1503_s22 }
  0xa1   : > { %v1773_v60 = vpop.permute.xlu1 %345  ;;  %v1775_v61 = vpop.permute.xlu2 %365 }
  0xa2   : > { %v1777_v62 = vpop.permute.xlu0 %343 }
  0xa7   : > { %1425 = vrot.lane.b32.xlu1 %v1611_v30, %s1503_s22  ;;  %597 = vrot.lane.b32.xlu2 %v1615_v31, %s1503_s22  ;;  %v1337_v30 = vunpack.i.l.bf16 %v1336_v49 }
  0xa8   : > { %1420 = vrot.lane.b32.xlu0 %v1619_v32, %s1503_s22  ;;  %v320_v32 = vadd.f32 %v1338_v25, %v1571_v16  ;;  %v1313_v25 = vunpack.i.h.bf16 %v1744_v53 }
  0xa9   : > { %v1785_v63 = vpop.permute.xlu1 %351  ;;  %v1787_v0 = vpop.permute.xlu2 %371  ;;  %v319_v51 = vadd.f32 %v1337_v30, %v1569_v15  ;;  %v392_v30 = vadd.f32 %v1742_v52, %v1633_v34 }
  0xaa   : > { %v1789_v1 = vpop.permute.xlu0 %349 }
  0xaf   : > { %601 = vrot.lane.b32.xlu1 %v1629_v33, %s1503_s22  ;;  %603 = vrot.lane.b32.xlu2 %v1633_v34, %s1503_s22 }
  0xb0   : > { %599 = vrot.lane.b32.xlu0 %v1637_v35, %s1503_s22 }
  0xb1   : > { %v1797_v10 = vpop.permute.xlu1 %357  ;;  %v1361_v11 = vpop.permute.xlu2 %1360 }
  0xb2   : > { %v1801_v14 = vpop.permute.xlu0 %355  ;;  %v1363_v21 = vunpack.i.h.bf16 %v1361_v11  ;;  %v1362_v22 = vunpack.i.l.bf16 %v1361_v11 }
  0xb4   : > { %v1803_v23 = vadd.f32 %v1363_v21, %v314_v12  ;;  %v1805_v24 = vadd.f32 %v1362_v22, %v313_v13  ;;  %v1318_v21 = vunpack.i.h.bf16 %v1753_v56  ;;  %v1317_v22 = vunpack.i.l.bf16 %v1753_v56 }
  0xb6   : > { %v311_v56 = vadd.f32 %v1317_v22, %v1579_v19  ;;  %v1332_v19 = vunpack.i.l.bf16 %v1729_v48  ;;  %v1328_v22 = vunpack.i.h.bf16 %v1749_v54 }
  0xb7   : > { %607 = vrot.lane.b32.xlu1 %v1647_v36, %s1503_s22  ;;  %609 = vrot.lane.b32.xlu2 %v1651_v37, %s1503_s22 }
  0xb8   : > { %605 = vrot.lane.b32.xlu0 %v1655_v38, %s1503_s22 }
  0xb9   : > { %v1813_v5 = vpop.permute.xlu1 %363  ;;  %v1376_v6 = vpop.permute.xlu2 %1375 }
  0xba   : > { %v1817_v2 = vpop.permute.xlu0 %361  ;;  %v1378_v9 = vunpack.i.h.bf16 %v1376_v6  ;;  %v1377_v49 = vunpack.i.l.bf16 %v1376_v6  ;;  %v312_v6 = vadd.f32 %v1318_v21, %v1581_v20  ;;  %v1333_v20 = vunpack.i.h.bf16 %v1729_v48 }
  0xbb   : > { %2380 = vst [vmem:[#allocation5_spill] sm:$0xff] %v1817_v2 }
  0xbc   : > { %v1819_v11 = vadd.f32 %v1378_v9, %v320_v32  ;;  %v1821_v12 = vadd.f32 %v1377_v49, %v319_v51 }
  0xbe   : > { %2381 = vst [vmem:[#allocation6_spill] sm:$0xff] %v1821_v12  ;;  %v310_v12 = vadd.f32 %v1313_v25, %v1551_v8  ;;  %v395_v8 = vadd.f32 %v1751_v55, %v1651_v37  ;;  %v317_v25 = vadd.f32 %v1332_v19, %v1541_v3  ;;  %v1347_v19 = vunpack.i.l.bf16 %v1761_v57 }
  0xbf   : > { %613 = vrot.lane.b32.xlu1 %v1665_v39, %s1503_s22  ;;  %615 = vrot.lane.b32.xlu2 %v1669_v40, %s1503_s22 }
  0xc0   : > { %611 = vrot.lane.b32.xlu0 %v1673_v41, %s1503_s22 }
  0xc1   : > { %v1829_v16 = vpop.permute.xlu1 %369  ;;  %v1831_v15 = vpop.permute.xlu2 %469 }
  0xc2   : > { %2382 = vst [vmem:[#allocation7_spill] sm:$0xff] %v1829_v16  ;;  %v1833_v13 = vpop.permute.xlu0 %367 }
  0xc3   : > { %2383 = vst [vmem:[#allocation8_spill] sm:$0xff] %v1833_v13 }
  0xc7   : > { %619 = vrot.lane.b32.xlu1 %v1683_v42, %s1503_s22  ;;  %621 = vrot.lane.b32.xlu2 %v1687_v43, %s1503_s22 }
  0xc8   : > { %617 = vrot.lane.b32.xlu0 %v1691_v44, %s1503_s22 }
  0xc9   : > { %v1356_v32 = vpop.permute.xlu1 %1355  ;;  %v476_v51 = vpop.permute.xlu2 %475 }
  0xca   : > { %v1358_v9 = vunpack.i.h.bf16 %v1356_v32  ;;  %v1357_v49 = vunpack.i.l.bf16 %v1356_v32  ;;  %v1848_v13 = vpop.permute.xlu0 %1350  ;;  %v1850_v16 = vadd.f32 %v476_v51, %v392_v30  ;;  %v1327_v32 = vunpack.i.l.bf16 %v1749_v54 }
  0xcb   : > { %v1353_v2 = vunpack.i.h.bf16 %v1848_v13 }
  0xcc   : > { %v1854_v34 = vadd.f32 %v1357_v49, %v311_v56  ;;  %v1856_v52 = vadd.f32 %v1358_v9, %v312_v6  ;;  %v316_v56 = vadd.f32 %v1328_v22, %v1575_v18  ;;  %v315_v9 = vadd.f32 %v1327_v32, %v1573_v17 }
  0xcd   : > { %v1859_v21 = vadd.f32 %v1353_v2, %v310_v12  ;;  %v318_v2 = vadd.f32 %v1333_v20, %v1543_v4  ;;  %v1348_v4 = vunpack.i.h.bf16 %v1761_v57  ;;  %v1342_v18 = vunpack.i.l.bf16 %v1765_v59 }
  0xce   : > { %v398_v17 = vadd.f32 %v1763_v58, %v1669_v40 }
  0xcf   : > { %625 = vrot.lane.b32.xlu1 %v1701_v45, %s1503_s22  ;;  %627 = vrot.lane.b32.xlu2 %v1705_v46, %s1503_s22  ;;  %v324_v22 = vadd.f32 %v1348_v4, %v1601_v27 }
  0xd0   : > { %623 = vrot.lane.b32.xlu0 %v1709_v47, %s1503_s22 }
  0xd1   : > { %v1371_v12 = vpop.permute.xlu1 %1370  ;;  %v482_v48 = vpop.permute.xlu2 %481 }
  0xd2   : > { %v1373_v30 = vunpack.i.h.bf16 %v1371_v12  ;;  %v1372_v54 = vunpack.i.l.bf16 %v1371_v12  ;;  %v1366_v6 = vpop.permute.xlu0 %1365  ;;  %v1874_v51 = vadd.f32 %v482_v48, %v395_v8  ;;  %v1343_v8 = vunpack.i.h.bf16 %v1765_v59 }
  0xd3   : > { %v1368_v49 = vunpack.i.h.bf16 %v1366_v6  ;;  %v1367_v37 = vunpack.i.l.bf16 %v1366_v6  ;;  %v323_v12 = vadd.f32 %v1347_v19, %v1599_v26  ;;  %v321_v6 = vadd.f32 %v1342_v18, %v1605_v28 }
  0xd4   : > { %v1878_v55 = vadd.f32 %v1373_v30, %v318_v2  ;;  %v1880_v47 = vadd.f32 %v1372_v54, %v317_v25  ;;  %v322_v57 = vadd.f32 %v1343_v8, %v1607_v29  ;;  %v401_v26 = vadd.f32 %v1775_v61, %v1687_v43 }
  0xd5   : > { %v1883_v20 = vadd.f32 %v1368_v49, %v316_v56  ;;  %v1885_v3 = vadd.f32 %v1367_v37, %v315_v9  ;;  %v404_v28 = vadd.f32 %v1787_v0, %v1705_v46 }
  0xd9   : > { %v1386_v32 = vpop.permute.xlu1 %1385  ;;  %v488_v2 = vpop.permute.xlu2 %487 }
  0xda   : > { %v1388_v48 = vunpack.i.h.bf16 %v1386_v32  ;;  %v1387_v25 = vunpack.i.l.bf16 %v1386_v32  ;;  %v1381_v30 = vpop.permute.xlu0 %1380  ;;  %v1894_v54 = vadd.f32 %v488_v2, %v398_v17 }
  0xdb   : > { %v1383_v56 = vunpack.i.h.bf16 %v1381_v30  ;;  %v1382_v59 = vunpack.i.l.bf16 %v1381_v30  ;;  %v1352_v30 = vunpack.i.l.bf16 %v1848_v13 }
  0xdc   : > { %v1898_v9 = vadd.f32 %v1388_v48, %v324_v22  ;;  %v1900_v40 = vadd.f32 %v1387_v25, %v323_v12  ;;  %v1312_v25 = vunpack.i.l.bf16 %v1744_v53 }
  0xdd   : > { %v1902_v27 = vadd.f32 %v1382_v59, %v321_v6  ;;  %v1904_v58 = vadd.f32 %v1383_v56, %v322_v57 }
  0xde   : > { %2384 = vst [vmem:[#allocation9_spill] sm:$0xff] %v1900_v40  ;;  %v309_v57 = vadd.f32 %v1312_v25, %v1549_v7 }
  0xdf   : > { %2385 = vst [vmem:[#allocation10_spill] sm:$0xff] %v1904_v58 }
  0xe1   : > { %v1908_v49 = vpop.permute.xlu1 %473  ;;  %v494_v37 = vpop.permute.xlu2 %493 }
  0xe2   : > { %v1910_v4 = vpop.permute.xlu0 %471  ;;  %v1912_v29 = vadd.f32 %v494_v37, %v401_v26  ;;  %v389_v37 = vadd.f32 %v1737_v50, %v1615_v31 }
  0xe4   : > { %v517_v58 = vadd.f32 %v1831_v15, %v389_v37 }
  0xe9   : > { %v1916_v19 = vpop.permute.xlu1 %479  ;;  %v500_v8 = vpop.permute.xlu2 %499 }
  0xea   : > { %v1918_v18 = vpop.permute.xlu0 %477  ;;  %v1920_v17 = vadd.f32 %v500_v8, %v404_v28  ;;  %v453_v28 = vadd.f32 %v1352_v30, %v309_v57 }
  0xf1   : > { %v1922_v22 = vpop.permute.xlu1 %485  ;;  %v1924_v43 = vpop.permute.xlu2 %1400 }
  0xf2   : > { %v1926_v61 = vpop.permute.xlu0 %483 }
  0xf9   : > { %v1928_v32 = vpop.permute.xlu1 %491  ;;  %v1930_v2 = vpop.permute.xlu2 %1415 }
  0xfa   : > { %v1932_v12 = vpop.permute.xlu0 %489 }
 0x101   : > { %v1934_v46 = vpop.permute.xlu1 %497  ;;  %v598_v0 = vpop.permute.xlu2 %597 }
 0x102   : > { %2386 = vst [vmem:[#allocation11_spill] sm:$0xff] %v1934_v46  ;;  %v1936_v48 = vpop.permute.xlu0 %495  ;;  %v645_v7 = vadd.f32 %v598_v0, %v517_v58 }
 0x103   : > { %2387 = vst [vmem:[#allocation12_spill] sm:$0xff] %v1936_v48 }
 0x109   : > { %v1396_v6 = vpop.permute.xlu1 %1395  ;;  %v604_v56 = vpop.permute.xlu2 %603 }
 0x10a   : > { %v1398_v59 = vunpack.i.h.bf16 %v1396_v6  ;;  %v1391_v26 = vpop.permute.xlu0 %1390  ;;  %v1948_v53 = vadd.f32 %v604_v56, %v1850_v16  ;;  %v1397_v57 = vunpack.i.l.bf16 %v1396_v6 }
 0x10b   : > { %v1392_v8 = vunpack.i.l.bf16 %v1391_v26 }
 0x10c   : > { %v584_v46 = vadd.f32 %v1398_v59, %v1856_v52  ;;  %v583_v6 = vadd.f32 %v1397_v57, %v1854_v34 }
 0x10d   : > { %v581_v48 = vadd.f32 %v1392_v8, %v453_v28 }
 0x10e   : > { %v1945_v40 = vmul.f32 %v584_v46, %v584_v46 }
 0x10f   : > { %v661_v13 = vmul.f32 %v581_v48, %v581_v48 }
 0x110   : > { %v680_v25 = vsub.f32 %v1945_v40, %v1948_v53 }
 0x111   : > { %v1952_v45 = vpop.permute.xlu1 %1410  ;;  %v610_v31 = vpop.permute.xlu2 %609  ;;  %v677_v50 = vsub.f32 %v661_v13, %v645_v7  ;;  %v391_v13 = vadd.f32 %v1773_v60, %v1629_v33 }
 0x112   : > { %v1413_v52 = vunpack.i.h.bf16 %v1952_v45  ;;  %v1955_v30 = vpop.permute.xlu0 %1405  ;;  %v1964_v48 = vadd.f32 %v610_v31, %v1874_v51 }
 0x113   : > { %v1407_v15 = vunpack.i.l.bf16 %v1955_v30  ;;  %v694_v46 = vsel %vm693_vm0, %v677_v50, 0.0  ;;  %v390_v50 = vadd.f32 %v1777_v62, %v1637_v35  ;;  %v1402_v35 = vunpack.i.l.bf16 %v1924_v43 }
 0x114   : > { %695 = vadd.xlane.f32.xlu0 %v694_v46  ;;  %v590_v58 = vadd.f32 %v1413_v52, %v1878_v55  ;;  %v1393_v55 = vunpack.i.h.bf16 %v1391_v26  ;;  %v663_v46 = vmul.f32 %v583_v6, %v583_v6 }
 0x115   : > { %v587_v16 = vadd.f32 %v1407_v15, %v1885_v3  ;;  %v518_v26 = vadd.f32 %v1910_v4, %v390_v50  ;;  %v1403_v15 = vunpack.i.h.bf16 %v1924_v43  ;;  %v585_v43 = vadd.f32 %v1402_v35, %v1805_v24 }
 0x116   : > { %v1970_v28 = vmul.f32 %v590_v58, %v590_v58  ;;  %v582_v52 = vadd.f32 %v1393_v55, %v1859_v21  ;;  %v1408_v24 = vunpack.i.h.bf16 %v1955_v30  ;;  %v396_v30 = vadd.f32 %v1801_v14, %v1673_v41 }
 0x117   : > { %v1961_v0 = vmul.f32 %v587_v16, %v587_v16 }
 0x118   : > { %v662_v62 = vmul.f32 %v582_v52, %v582_v52 }
 0x119   : > { %v1966_v56 = vpop.permute.xlu1 %1425  ;;  %v616_v59 = vpop.permute.xlu2 %615  ;;  %v683_v37 = vsub.f32 %v1961_v0, %v1964_v48 }
 0x11a   : > { %v1972_v8 = vpop.permute.xlu0 %1420  ;;  %v1975_v3 = vadd.f32 %v616_v59, %v1894_v54  ;;  %v519_v54 = vadd.f32 %v1908_v49, %v391_v13  ;;  %v1428_v34 = vunpack.i.h.bf16 %v1966_v56  ;;  %v586_v59 = vadd.f32 %v1403_v15, %v1803_v23 }
 0x11b   : > { %v1422_v7 = vunpack.i.l.bf16 %v1972_v8  ;;  %v1427_v0 = vunpack.i.l.bf16 %v1966_v56 }
 0x11c   : > { %v686_v51 = vsub.f32 %v1970_v28, %v1975_v3  ;;  %v596_v6 = vadd.f32 %v1428_v34, %v1898_v9  ;;  %v666_v52 = vmul.f32 %v586_v59, %v586_v59 }
 0x11d   : > { %v593_v31 = vadd.f32 %v1422_v7, %v1902_v27  ;;  %v394_v7 = vadd.f32 %v1785_v63, %v1647_v36  ;;  %v1412_v63 = vunpack.i.l.bf16 %v1952_v45 }
 0x11e   : > { %v2011_v9 = vmul.f32 %v596_v6, %v596_v6 }
 0x11f   : > { %v1991_v57 = vmul.f32 %v593_v31, %v593_v31  ;;  %v522_v50 = vadd.f32 %v1916_v19, %v394_v7  ;;  %v589_v45 = vadd.f32 %v1412_v63, %v1880_v47 }
 0x121   : > { %v602_v16 = vpop.permute.xlu1 %601  ;;  %v622_v58 = vpop.permute.xlu2 %621  ;;  %v669_v40 = vmul.f32 %v589_v45, %v589_v45 }
 0x122   : > { %v647_v33 = vadd.f32 %v602_v16, %v519_v54  ;;  %v600_v60 = vpop.permute.xlu0 %599  ;;  %v1994_v27 = vadd.f32 %v622_v58, %v1912_v29  ;;  %v393_v29 = vadd.f32 %v1789_v1, %v1655_v38  ;;  %v665_v1 = vmul.f32 %v585_v43, %v585_v43 }
 0x123   : > { %v646_v21 = vadd.f32 %v600_v60, %v518_v26  ;;  %v397_v58 = vadd.f32 %v1797_v10, %v1665_v39  ;;  %v524_v39 = vadd.f32 %v1926_v61, %v396_v30  ;;  %v1418_v10 = vunpack.i.h.bf16 %v1930_v2 }
 0x124   : > { %v679_v49 = vsub.f32 %v663_v46, %v647_v33  ;;  %v689_v4 = vsub.f32 %v1991_v57, %v1994_v27  ;;  %v521_v23 = vadd.f32 %v1918_v18, %v393_v29  ;;  %v588_v33 = vadd.f32 %v1408_v24, %v1883_v20  ;;  %v759_v57 = vld [vmem:[%s2076_s26 + $0x8] sm:$0xff]  ;;  %v758_v27 = vld [vmem:[%s2076_s26] sm:$0xff] }
 0x125   : > { %v678_v55 = vsub.f32 %v662_v62, %v646_v21  ;;  %v525_v35 = vadd.f32 %v1922_v22, %v397_v58  ;;  %v1417_v62 = vunpack.i.l.bf16 %v1930_v2  ;;  %v592_v22 = vadd.f32 %v1418_v10, %v1819_v11  ;;  %v2389_v2 = vld [vmem:[#allocation6_spill] sm:$0xff]  ;;  %v2397_v58 = vld [vmem:[#allocation12_spill] sm:$0xff] }
 0x126   : > { %v700_v13 = vsel %vm693_vm0, %v679_v49, 0.0  ;;  %v668_v41 = vmul.f32 %v588_v33, %v588_v33  ;;  %v400_v49 = vadd.f32 %v1813_v5, %v1683_v42  ;;  %v712_v61 = vsel %vm693_vm0, %v683_v37, 0.0 }
 0x127   : > { %v697_v31 = vsel %vm693_vm0, %v678_v55, 0.0  ;;  %701 = vadd.xlane.f32.xlu2 %v700_v13  ;;  %v2388_v55 = vld [vmem:[#allocation5_spill] sm:$0xff]  ;;  %v591_v6 = vadd.f32 %v1417_v62, %v2389_v2  ;;  %v672_v11 = vmul.f32 %v592_v22, %v592_v22  ;;  %v775_v10 = vsel %vm774_vm1, %v758_v27, 0.0  ;;  %v761_v62 = vld [vmem:[%s2076_s26 + $0x18] sm:$0xff] }
 0x128   : > { %698 = vadd.xlane.f32.xlu1 %v697_v31  ;;  %v399_v7 = vadd.f32 %v2388_v55, %v1691_v44  ;;  %v528_v29 = vadd.f32 %v1928_v32, %v400_v49  ;;  %v1423_v44 = vunpack.i.h.bf16 %v1972_v8  ;;  %v2392_v32 = vld [vmem:[#allocation9_spill] sm:$0xff]  ;;  %v2395_v8 = vld [vmem:[#allocation10_spill] sm:$0xff]  ;;  %v767_v55 = vld [vmem:[%s2076_s26 + $0x48] sm:$0xff] }
 0x129   : > { %v608_v54 = vpop.permute.xlu1 %607  ;;  %v628_v36 = vpop.permute.xlu2 %627  ;;  %v671_v43 = vmul.f32 %v591_v6, %v591_v6  ;;  %v595_v63 = vadd.f32 %v1427_v0, %v2392_v32  ;;  %v802_v6 = vsel %vm774_vm1, %v767_v55, 0.0 }
 0x12a   : > { %v650_v26 = vadd.f32 %v608_v54, %v522_v50  ;;  %v606_v15 = vpop.permute.xlu0 %605  ;;  %v2014_v38 = vadd.f32 %v628_v36, %v1920_v17  ;;  %v703_v17 = vsel %vm693_vm0, %v680_v25, 0.0  ;;  %v527_v42 = vadd.f32 %v1932_v12, %v399_v7  ;;  %v2391_v54 = vld [vmem:[#allocation7_spill] sm:$0xff] }
 0x12b   : > { %v649_v46 = vadd.f32 %v606_v15, %v521_v23  ;;  %v721_v12 = vsel %vm693_vm0, %v686_v51, 0.0  ;;  %v2394_v15 = vld [vmem:[#allocation8_spill] sm:$0xff]  ;;  %v594_v24 = vadd.f32 %v1423_v44, %v2395_v8  ;;  %v675_v51 = vmul.f32 %v595_v63, %v595_v63 }
 0x12c   : > { %v682_v19 = vsub.f32 %v666_v52, %v650_v26  ;;  %v692_v18 = vsub.f32 %v2011_v9, %v2014_v38  ;;  %v2390_v52 = vld [vmem:[#allocation3_spill] sm:$0xff]  ;;  %v2393_v26 = vld [vmem:[#allocation4_spill] sm:$0xff]  ;;  %v765_v38 = vld [vmem:[%s2076_s26 + $0x38] sm:$0xff] }
 0x12d   : > { %v681_v16 = vsub.f32 %v665_v1, %v649_v46  ;;  %v403_v36 = vadd.f32 %v2391_v54, %v2390_v52  ;;  %v402_v1 = vadd.f32 %v2394_v15, %v2393_v26  ;;  %v763_v9 = vld [vmem:[%s2076_s26 + $0x28] sm:$0xff]  ;;  %v796_v49 = vsel %vm774_vm1, %v765_v38, 0.0 }
 0x12e   : > { %v709_v34 = vsel %vm693_vm0, %v682_v19, 0.0  ;;  %v2396_v19 = vld [vmem:[#allocation11_spill] sm:$0xff] }
 0x12f   : > { %704 = vadd.xlane.f32.xlu2 %v703_v17  ;;  %v706_v60 = vsel %vm693_vm0, %v681_v16, 0.0  ;;  %v531_v16 = vadd.f32 %v2396_v19, %v403_v36  ;;  %v530_v28 = vadd.f32 %v2397_v58, %v402_v1  ;;  %v2119_v58 = vstv %s839_s27 }
 0x130   : > { %710 = vadd.xlane.f32.xlu1 %v709_v34  ;;  %707 = vadd.xlane.f32.xlu0 %v706_v60  ;;  %v674_v34 = vmul.f32 %v594_v24, %v594_v24 }
 0x131   : > { %v614_v47 = vpop.permute.xlu1 %613 }
 0x132   : > { %v653_v53 = vadd.f32 %v614_v47, %v525_v35  ;;  %v612_v25 = vpop.permute.xlu0 %611  ;;  %v730_v35 = vsel %vm693_vm0, %v689_v4, 0.0  ;;  %v778_v4 = vsel %vm774_vm1, %v759_v57, 0.0 }
 0x133   : > { %v652_v14 = vadd.f32 %v612_v25, %v524_v39  ;;  %v762_v25 = vld [vmem:[%s2076_s26 + $0x20] sm:$0xff] }
 0x134   : > { %v685_v20 = vsub.f32 %v669_v40, %v653_v53  ;;  %v739_v40 = vsel %vm693_vm0, %v692_v18, 0.0  ;;  %v760_v53 = vld [vmem:[%s2076_s26 + $0x10] sm:$0xff] }
 0x135   : > { %v684_v21 = vsub.f32 %v668_v41, %v652_v14  ;;  %v781_v41 = vsel %vm774_vm1, %v760_v53, 0.0  ;;  %v787_v14 = vsel %vm774_vm1, %v762_v25, 0.0  ;;  %v764_v18 = vld [vmem:[%s2076_s26 + $0x30] sm:$0xff] }
 0x136   : > { %v718_v59 = vsel %vm693_vm0, %v685_v20, 0.0  ;;  %v784_v20 = vsel %vm774_vm1, %v761_v62, 0.0  ;;  %v793_v22 = vsel %vm774_vm1, %v764_v18, 0.0 }
 0x137   : > { %713 = vadd.xlane.f32.xlu2 %v712_v61  ;;  %v715_v13 = vsel %vm693_vm0, %v684_v21, 0.0  ;;  %v790_v21 = vsel %vm774_vm1, %v763_v9, 0.0  ;;  %v766_v61 = vld [vmem:[%s2076_s26 + $0x40] sm:$0xff] }
 0x138   : > { %719 = vadd.xlane.f32.xlu1 %v718_v59  ;;  %716 = vadd.xlane.f32.xlu0 %v715_v13  ;;  %v768_v59 = vld [vmem:[%s2076_s26 + $0x50] sm:$0xff]  ;;  %v799_v7 = vsel %vm774_vm1, %v766_v61, 0.0  ;;  %v769_v13 = vld [vmem:[%s2076_s26 + $0x58] sm:$0xff] }
 0x139   : > { %v620_v5 = vpop.permute.xlu1 %619  ;;  %v805_v2 = vsel %vm774_vm1, %v768_v59, 0.0 }
 0x13a   : > { %v656_v48 = vadd.f32 %v620_v5, %v528_v29  ;;  %v618_v37 = vpop.permute.xlu0 %617  ;;  %v771_v29 = vld [vmem:[%s2076_s26 + $0x68] sm:$0xff]  ;;  %v808_v5 = vsel %vm774_vm1, %v769_v13, 0.0 }
 0x13b   : > { %v655_v31 = vadd.f32 %v618_v37, %v527_v42  ;;  %v770_v42 = vld [vmem:[%s2076_s26 + $0x60] sm:$0xff]  ;;  %v773_v37 = vld [vmem:[%s2076_s26 + $0x78] sm:$0xff] }
 0x13c   : > { %v688_v50 = vsub.f32 %v672_v11, %v656_v48  ;;  %v814_v11 = vsel %vm774_vm1, %v771_v29, 0.0  ;;  %v811_v0 = vsel %vm774_vm1, %v770_v42, 0.0  ;;  %v772_v48 = vld [vmem:[%s2076_s26 + $0x70] sm:$0xff]  ;;  %v820_v44 = vsel %vm774_vm1, %v773_v37, 0.0 }
 0x13d   : > { %v687_v23 = vsub.f32 %v671_v43, %v655_v31  ;;  %v817_v43 = vsel %vm774_vm1, %v772_v48, 0.0 }
 0x13e   : > { %v727_v56 = vsel %vm693_vm0, %v688_v50, 0.0 }
 0x13f   : > { %722 = vadd.xlane.f32.xlu2 %v721_v12  ;;  %v724_v46 = vsel %vm693_vm0, %v687_v23, 0.0 }
 0x140   : > { %728 = vadd.xlane.f32.xlu1 %v727_v56  ;;  %725 = vadd.xlane.f32.xlu0 %v724_v46 }
 0x141   : > { %v626_v3 = vpop.permute.xlu1 %625 }
 0x142   : > { %v659_v45 = vadd.f32 %v626_v3, %v531_v16  ;;  %v624_v17 = vpop.permute.xlu0 %623 }
 0x143   : > { %v658_v30 = vadd.f32 %v624_v17, %v530_v28 }
 0x144   : > { %v691_v33 = vsub.f32 %v675_v51, %v659_v45 }
 0x145   : > { %v690_v60 = vsub.f32 %v674_v34, %v658_v30 }
 0x146   : > { %v736_v39 = vsel %vm693_vm0, %v691_v33, 0.0 }
 0x147   : > { %731 = vadd.xlane.f32.xlu2 %v730_v35  ;;  %v733_v47 = vsel %vm693_vm0, %v690_v60, 0.0 }
 0x148   : > { %737 = vadd.xlane.f32.xlu1 %v736_v39  ;;  %734 = vadd.xlane.f32.xlu0 %v733_v47 }
 0x14f   : > { %740 = vadd.xlane.f32.xlu2 %v739_v40 }
 0x150   : > { %779 = vadd.xlane.f32.xlu1 %v778_v4  ;;  %776 = vadd.xlane.f32.xlu0 %v775_v10 }
 0x157   : > { %782 = vadd.xlane.f32.xlu2 %v781_v41 }
 0x158   : > { %788 = vadd.xlane.f32.xlu1 %v787_v14  ;;  %785 = vadd.xlane.f32.xlu0 %v784_v20 }
 0x15f   : > { %791 = vadd.xlane.f32.xlu2 %v790_v21 }
 0x160   : > { %797 = vadd.xlane.f32.xlu1 %v796_v49  ;;  %794 = vadd.xlane.f32.xlu0 %v793_v22 }
 0x167   : > { %800 = vadd.xlane.f32.xlu2 %v799_v7 }
 0x168   : > { %806 = vadd.xlane.f32.xlu1 %v805_v2  ;;  %803 = vadd.xlane.f32.xlu0 %v802_v6 }
 0x16f   : > { %809 = vadd.xlane.f32.xlu2 %v808_v5 }
 0x170   : > { %815 = vadd.xlane.f32.xlu1 %v814_v11  ;;  %812 = vadd.xlane.f32.xlu0 %v811_v0 }
 0x177   : > { %818 = vadd.xlane.f32.xlu2 %v817_v43 }
 0x178   : > { %821 = vadd.xlane.f32.xlu0 %v820_v44 }
 0x187   : > { %v696_v50 = vpop.xlane.xlu0 %695 }
 0x188   : > { %v742_v46 = vmul.f32 0.5, %v696_v50 }
 0x19a   : > { %v702_v31 = vpop.xlane.xlu2 %701 }
 0x19b   : > { %v699_v23 = vpop.xlane.xlu1 %698  ;;  %v744_v60 = vmul.f32 0.5, %v702_v31 }
 0x19c   : > { %v743_v19 = vmul.f32 0.5, %v699_v23 }
 0x1a2   : > { %v705_v52 = vpop.xlane.xlu2 %704 }
 0x1a3   : > { %v711_v54 = vpop.xlane.xlu1 %710  ;;  %v708_v36 = vpop.xlane.xlu0 %707  ;;  %v745_v35 = vmul.f32 0.5, %v705_v52 }
 0x1a4   : > { %v746_v39 = vmul.f32 0.5, %v708_v36  ;;  %v747_v18 = vmul.f32 0.5, %v711_v54 }
 0x1aa   : > { %v714_v32 = vpop.xlane.xlu2 %713 }
 0x1ab   : > { %v720_v63 = vpop.xlane.xlu1 %719  ;;  %v717_v12 = vpop.xlane.xlu0 %716  ;;  %v748_v42 = vmul.f32 0.5, %v714_v32 }
 0x1ac   : > { %v749_v22 = vmul.f32 0.5, %v717_v12  ;;  %v750_v0 = vmul.f32 0.5, %v720_v63 }
 0x1b2   : > { %v723_v56 = vpop.xlane.xlu2 %722 }
 0x1b3   : > { %v729_v26 = vpop.xlane.xlu1 %728  ;;  %v726_v15 = vpop.xlane.xlu0 %725  ;;  %v2132_v37 = vmul.f32 0.5, %v723_v56 }
 0x1b4   : > { %v2134_v43 = vmul.f32 0.5, %v729_v26  ;;  %v2137_v31 = vmul.f32 0.5, %v726_v15 }
 0x1ba   : > { %v732_v1 = vpop.xlane.xlu2 %731 }
 0x1bb   : > { %v738_v8 = vpop.xlane.xlu1 %737  ;;  %v2115_v24 = vpop.xlane.xlu0 %734  ;;  %v2139_v50 = vmul.f32 0.5, %v732_v1 }
 0x1bc   : > { %v2141_v23 = vmul.f32 0.5, %v738_v8  ;;  %v2148_v26 = vmul.f32 0.5, %v2115_v24 }
 0x1c2   : > { %v2117_v16 = vpop.xlane.xlu2 %740 }
 0x1c3   : > { %v780_v28 = vpop.xlane.xlu1 %779  ;;  %v777_v3 = vpop.xlane.xlu0 %776 }
 0x1c4   : > { %v824_v51 = vadd.f32 %v780_v28, %v743_v19  ;;  %v823_v45 = vadd.f32 %v777_v3, %v742_v46  ;;  %v2155_v19 = vmul.f32 0.5, %v2117_v16 }
 0x1c6   : > { %v842_v17 = vadd.f32 %v2119_v58, %v824_v51  ;;  %v841_v34 = vadd.f32 %v2119_v58, %v823_v45 }
 0x1c8   : > { %v858_v30 = vsub.f32 0.0, %v842_v17  ;;  %v857_v33 = vsub.f32 0.0, %v841_v34 }
 0x1ca   : > { %v875_v47 = vmul.f32 1.442695, %v858_v30  ;;  %v873_v57 = vmul.f32 1.442695, %v857_v33  ;;  %v783_v27 = vpop.xlane.xlu2 %782 }
 0x1cb   : > { %v825_v4 = vadd.f32 %v783_v27, %v744_v60  ;;  %v789_v10 = vpop.xlane.xlu1 %788  ;;  %v786_v40 = vpop.xlane.xlu0 %785 }
 0x1cc   : > { %1429 = vpow2.f32 %v875_v47  ;;  %v827_v53 = vadd.f32 %v789_v10, %v746_v39  ;;  %v826_v25 = vadd.f32 %v786_v40, %v745_v35 }
 0x1cd   : > { %1431 = vpow2.f32 %v873_v57  ;;  %v843_v62 = vadd.f32 %v2119_v58, %v825_v4 }
 0x1ce   : > { %v845_v41 = vadd.f32 %v2119_v58, %v827_v53  ;;  %v844_v14 = vadd.f32 %v2119_v58, %v826_v25 }
 0x1cf   : > { %v859_v20 = vsub.f32 0.0, %v843_v62 }
 0x1d0   : > { %v861_v9 = vsub.f32 0.0, %v845_v41  ;;  %v860_v38 = vsub.f32 0.0, %v844_v14 }
 0x1d1   : > { %v877_v21 = vmul.f32 1.442695, %v859_v20 }
 0x1d2   : > { %v1430_v49 = vpop.eup %1429  ;;  %v881_v61 = vmul.f32 1.442695, %v861_v9  ;;  %v792_v59 = vpop.xlane.xlu2 %791  ;;  %v879_v2 = vmul.f32 1.442695, %v860_v38 }
 0x1d3   : > { %v1432_v55 = vpop.eup %1431  ;;  %v2126_v7 = vadd.f32 1.0, %v1430_v49  ;;  %1433 = vpow2.f32 %v877_v21  ;;  %v828_v6 = vadd.f32 %v792_v59, %v747_v18  ;;  %v798_v13 = vpop.xlane.xlu1 %797 }
 0x1d4   : > { %v795_v29 = vpop.xlane.xlu0 %794  ;;  %v2128_v5 = vadd.f32 1.0, %v1432_v55  ;;  %1435 = vpow2.f32 %v881_v61  ;;  %v830_v11 = vadd.f32 %v798_v13, %v749_v22 }
 0x1d5   : > { %1437 = vrcp.f32 %v2126_v7  ;;  %v829_v48 = vadd.f32 %v795_v29, %v748_v42  ;;  %v846_v44 = vadd.f32 %v2119_v58, %v828_v6  ;;  %v945_v52 = vand.u32 2147483647, %v2126_v7 }
 0x1d6   : > { %1439 = vrcp.f32 %v2128_v5  ;;  %v947_v36 = vand.u32 2147483648, %v2126_v7  ;;  %v930_v32 = vand.u32 2147483647, %v2128_v5  ;;  %v848_v12 = vadd.f32 %v2119_v58, %v830_v11 }
 0x1d7   : > { %1441 = vpow2.f32 %v879_v2  ;;  %v862_v63 = vsub.f32 0.0, %v846_v44  ;;  %v932_v15 = vand.u32 2147483648, %v2128_v5  ;;  %v847_v8 = vadd.f32 %v2119_v58, %v829_v48 }
 0x1d8   : > { %vm941_vm3 = vweird.f32 %v2126_v7  ;;  %vm926_vm4 = vweird.f32 %v2128_v5  ;;  %vm2162_vm5 = vcmp.eq.f32.partialorder %v945_v52, 8.507059e+37  ;;  %v948_v34 = vor.u32 1.1754944e-38, %v947_v36 }
 0x1d9   : > { %v1434_v54 = vpop.eup %1433  ;;  %v883_v45 = vmul.f32 1.442695, %v862_v63  ;;  %vm2168_vm6 = vcmp.eq.f32.partialorder %v930_v32, 8.507059e+37  ;;  %v864_v60 = vsub.f32 0.0, %v848_v12  ;;  %v933_v39 = vor.u32 1.1754944e-38, %v932_v15 }
 0x1da   : > { %v1436_v56 = vpop.eup %1435  ;;  %v2151_v1 = vadd.f32 1.0, %v1434_v54  ;;  %v801_v17 = vpop.xlane.xlu2 %800  ;;  %v863_v47 = vsub.f32 0.0, %v847_v8 }
 0x1db   : > { %v1438_v46 = vpop.eup %1437  ;;  %v2159_v28 = vadd.f32 1.0, %v1436_v56  ;;  %v831_v10 = vadd.f32 %v801_v17, %v750_v0  ;;  %v887_v62 = vmul.f32 1.442695, %v864_v60  ;;  %v807_v41 = vpop.xlane.xlu1 %806 }
 0x1dc   : > { %v1440_v3 = vpop.eup %1439  ;;  %v937_v24 = vmul.f32 %v1438_v46, %v2126_v7  ;;  %1443 = vrcp.f32 %v2151_v1  ;;  %v960_v27 = vand.u32 2147483647, %v2151_v1  ;;  %v962_v4 = vand.u32 2147483648, %v2151_v1  ;;  %v804_v42 = vpop.xlane.xlu0 %803 }
 0x1dd   : > { %v1442_v16 = vpop.eup %1441  ;;  %v922_v30 = vmul.f32 %v1440_v3, %v2128_v5  ;;  %1445 = vrcp.f32 %v2159_v28  ;;  %vm942_vm7 = vweird.f32 %v1438_v46  ;;  %vm927_vm8 = vweird.f32 %v1440_v3 }
 0x1de   : > { %v938_v35 = vsub.f32 1.0, %v937_v24  ;;  %v2175_v53 = vadd.f32 1.0, %v1442_v16  ;;  %1447 = vpow2.f32 %v883_v45  ;;  %vm956_vm9 = vweird.f32 %v2151_v1  ;;  %vm943_vm10 = vmor %vm941_vm3, %vm942_vm7 }
 0x1df   : > { %v923_v57 = vsub.f32 1.0, %v922_v30  ;;  %v990_v9 = vand.u32 2147483647, %v2159_v28  ;;  %v885_v38 = vmul.f32 1.442695, %v863_v47  ;;  %vm2190_vm11 = vcmp.eq.f32.partialorder %v960_v27, 8.507059e+37  ;;  %vm928_vm13 = vmor %vm926_vm4, %vm927_vm8 }
 0x1e0   : > { %v939_v40 = vmul.f32 %v1438_v46, %v938_v35  ;;  %1449 = vrcp.f32 %v2175_v53  ;;  %v963_v22 = vor.u32 1.1754944e-38, %v962_v4  ;;  %vm986_vm12 = vweird.f32 %v2159_v28 }
 0x1e1   : > { %v924_v25 = vmul.f32 %v1440_v3, %v923_v57  ;;  %v992_v55 = vand.u32 2147483648, %v2159_v28  ;;  %1451 = vpow2.f32 %v887_v62  ;;  %v849_v7 = vadd.f32 %v2119_v58, %v831_v10 }
 0x1e2   : > { %v1444_v14 = vpop.eup %1443  ;;  %v940_v20 = vadd.f32 %v1438_v46, %v939_v40  ;;  %vm2207_vm14 = vcmp.eq.f32.partialorder %v990_v9, 8.507059e+37  ;;  %v975_v48 = vand.u32 2147483647, %v2175_v53  ;;  %1453 = vpow2.f32 %v885_v38 }
 0x1e3   : > { %v925_v18 = vadd.f32 %v1440_v3, %v924_v25  ;;  %v952_v21 = vmul.f32 %v1444_v14, %v2151_v1  ;;  %v1446_v61 = vpop.eup %1445  ;;  %vm957_vm15 = vweird.f32 %v1444_v14  ;;  %v993_v32 = vor.u32 1.1754944e-38, %v992_v55  ;;  %v816_v33 = vpop.xlane.xlu1 %815 }
 0x1e4   : > { %v944_v59 = vsel %vm943_vm10, %v1438_v46, %v940_v20  ;;  %v982_v29 = vmul.f32 %v1446_v61, %v2159_v28  ;;  %v1448_v11 = vpop.eup %1447  ;;  %vm971_vm0 = vweird.f32 %v2175_v53  ;;  %v977_v63 = vand.u32 2147483648, %v2175_v53  ;;  %v810_v46 = vpop.xlane.xlu2 %809  ;;  %vm958_vm3 = vmor %vm956_vm9, %vm957_vm15 }
 0x1e5   : > { %v949_v2 = vsel %vm2162_vm5, %v948_v34, %v944_v59  ;;  %v929_v6 = vsel %vm928_vm13, %v1440_v3, %v925_v18  ;;  %v953_v13 = vsub.f32 1.0, %v952_v21  ;;  %v2214_v54 = vadd.f32 1.0, %v1448_v11  ;;  %v813_v25 = vpop.xlane.xlu0 %812 }
 0x1e6   : > { %1163 = vst.msk [vmem:[%s2185_s30 + $0x8] sm:$0xff] %vm1161_vm2, %v949_v2  ;;  %v934_v5 = vsel %vm2168_vm6, %v933_v39, %v929_v6  ;;  %v983_v52 = vsub.f32 1.0, %v982_v29  ;;  %v1450_v36 = vpop.eup %1449  ;;  %v865_v12 = vsub.f32 0.0, %v849_v7  ;;  %vm987_vm1 = vweird.f32 %v1446_v61 }
 0x1e7   : > { %1162 = vst.msk [vmem:[%s2185_s30] sm:$0xff] %vm1161_vm2, %v934_v5  ;;  %v954_v44 = vmul.f32 %v1444_v14, %v953_v13  ;;  %v967_v8 = vmul.f32 %v1450_v36, %v2175_v53  ;;  %v1452_v3 = vpop.eup %1451  ;;  %vm2221_vm4 = vcmp.eq.f32.partialorder %v975_v48, 8.507059e+37  ;;  %1455 = vrcp.f32 %v2214_v54  ;;  %vm988_vm5 = vmor %vm986_vm12, %vm987_vm1 }
 0x1e8   : > { %v984_v15 = vmul.f32 %v1446_v61, %v983_v52  ;;  %v833_v51 = vadd.f32 %v807_v41, %v2137_v31  ;;  %v832_v45 = vadd.f32 %v804_v42, %v2132_v37  ;;  %v2228_v30 = vadd.f32 1.0, %v1452_v3  ;;  %v1454_v1 = vpop.eup %1453 }
 0x1e9   : > { %v955_v56 = vadd.f32 %v1444_v14, %v954_v44  ;;  %v968_v34 = vsub.f32 1.0, %v967_v8  ;;  %vm972_vm6 = vweird.f32 %v1450_v36  ;;  %v889_v35 = vmul.f32 1.442695, %v865_v12 }
 0x1ea   : > { %v985_v16 = vadd.f32 %v1446_v61, %v984_v15  ;;  %v834_v31 = vadd.f32 %v810_v46, %v2134_v43  ;;  %v1005_v47 = vand.u32 2147483647, %v2214_v54  ;;  %1457 = vrcp.f32 %v2228_v30  ;;  %vm973_vm7 = vmor %vm971_vm0, %vm972_vm6 }
 0x1eb   : > { %v959_v17 = vsel %vm958_vm3, %v1444_v14, %v955_v56  ;;  %v969_v39 = vmul.f32 %v1450_v36, %v968_v34  ;;  %v1007_v27 = vand.u32 2147483648, %v2214_v54  ;;  %v2243_v4 = vadd.f32 1.0, %v1454_v1 }
 0x1ec   : > { %v964_v60 = vsel %vm2190_vm11, %v963_v22, %v959_v17  ;;  %v989_v37 = vsel %vm988_vm5, %v1446_v61, %v985_v16  ;;  %v836_v28 = vadd.f32 %v816_v33, %v2148_v26  ;;  %1459 = vpow2.f32 %v889_v35  ;;  %v819_v3 = vpop.xlane.xlu2 %818 }
 0x1ed   : > { %1164 = vst.msk [vmem:[%s2185_s30 + $0x10] sm:$0xff] %vm1161_vm2, %v964_v60  ;;  %v994_v57 = vsel %vm2207_vm14, %v993_v32, %v989_v37  ;;  %v970_v43 = vadd.f32 %v1450_v36, %v969_v39  ;;  %v851_v10 = vadd.f32 %v2119_v58, %v833_v51  ;;  %v850_v40 = vadd.f32 %v2119_v58, %v832_v45  ;;  %v1456_v62 = vpop.eup %1455  ;;  %v822_v24 = vpop.xlane.xlu0 %821 }
 0x1ee   : > { %1166 = vst.msk [vmem:[%s2185_s30 + $0x20] sm:$0xff] %vm1161_vm2, %v994_v57  ;;  %v978_v41 = vor.u32 1.1754944e-38, %v977_v63  ;;  %v1035_v14 = vand.u32 2147483647, %v2228_v30  ;;  %v1037_v26 = vand.u32 2147483648, %v2228_v30  ;;  %1461 = vrcp.f32 %v2243_v4 }
 0x1ef   : > { %v974_v20 = vsel %vm973_vm7, %v1450_v36, %v970_v43  ;;  %v997_v9 = vmul.f32 %v1456_v62, %v2214_v54  ;;  %vm1001_vm8 = vweird.f32 %v2214_v54  ;;  %vm2258_vm9 = vcmp.eq.f32.partialorder %v1005_v47, 8.507059e+37 }
 0x1f0   : > { %v979_v53 = vsel %vm2221_vm4, %v978_v41, %v974_v20  ;;  %v1008_v18 = vor.u32 1.1754944e-38, %v1007_v27  ;;  %v867_v21 = vsub.f32 0.0, %v851_v10  ;;  %v866_v49 = vsub.f32 0.0, %v850_v40  ;;  %v1458_v22 = vpop.eup %1457 }
 0x1f1   : > { %1165 = vst.msk [vmem:[%s2185_s30 + $0x18] sm:$0xff] %vm1161_vm2, %v979_v53  ;;  %v998_v61 = vsub.f32 1.0, %v997_v9  ;;  %vm1031_vm10 = vweird.f32 %v2228_v30  ;;  %v852_v59 = vadd.f32 %v2119_v58, %v834_v31  ;;  %v854_v55 = vadd.f32 %v2119_v58, %v836_v28 }
 0x1f2   : > { %v1027_v7 = vmul.f32 %v1458_v22, %v2228_v30  ;;  %vm2270_vm11 = vcmp.eq.f32.partialorder %v1035_v14, 8.507059e+37  ;;  %v1038_v6 = vor.u32 1.1754944e-38, %v1037_v26  ;;  %v893_v13 = vmul.f32 1.442695, %v867_v21  ;;  %v1460_v29 = vpop.eup %1459 }
 0x1f3   : > { %v999_v42 = vmul.f32 %v1456_v62, %v998_v61  ;;  %vm1002_vm12 = vweird.f32 %v1456_v62  ;;  %v891_v11 = vmul.f32 1.442695, %v866_v49  ;;  %v868_v5 = vsub.f32 0.0, %v852_v59 }
 0x1f4   : > { %v1462_v0 = vpop.eup %1461  ;;  %v1028_v48 = vsub.f32 1.0, %v1027_v7  ;;  %v2274_v44 = vadd.f32 1.0, %v1460_v29  ;;  %1463 = vpow2.f32 %v893_v13  ;;  %v870_v52 = vsub.f32 0.0, %v854_v55  ;;  %vm1003_vm13 = vmor %vm1001_vm8, %vm1002_vm12 }
 0x1f5   : > { %v1000_v36 = vadd.f32 %v1456_v62, %v999_v42  ;;  %v1012_v32 = vmul.f32 %v1462_v0, %v2243_v4  ;;  %1465 = vpow2.f32 %v891_v11  ;;  %v835_v63 = vadd.f32 %v813_v25, %v2139_v50 }
 0x1f6   : > { %v1029_v12 = vmul.f32 %v1458_v22, %v1028_v48  ;;  %vm1032_vm14 = vweird.f32 %v1458_v22  ;;  %vm1016_vm15 = vweird.f32 %v2243_v4  ;;  %1467 = vrcp.f32 %v2274_v44 }
 0x1f7   : > { %v1004_v56 = vsel %vm1003_vm13, %v1456_v62, %v1000_v36  ;;  %v1013_v15 = vsub.f32 1.0, %v1012_v32  ;;  %v1020_v8 = vand.u32 2147483647, %v2243_v4  ;;  %v895_v46 = vmul.f32 1.442695, %v868_v5  ;;  %vm1033_vm0 = vmor %vm1031_vm10, %vm1032_vm14 }
 0x1f8   : > { %v1009_v50 = vsel %vm2258_vm9, %v1008_v18, %v1004_v56  ;;  %v1030_v51 = vadd.f32 %v1458_v22, %v1029_v12  ;;  %v1022_v54 = vand.u32 2147483648, %v2243_v4  ;;  %v899_v45 = vmul.f32 1.442695, %v870_v52 }
 0x1f9   : > { %1167 = vst.msk [vmem:[%s2185_s30 + $0x28] sm:$0xff] %vm1161_vm2, %v1009_v50  ;;  %v1014_v17 = vmul.f32 %v1462_v0, %v1013_v15  ;;  %vm1017_vm1 = vweird.f32 %v1462_v0  ;;  %1469 = vpow2.f32 %v895_v46  ;;  %v853_v16 = vadd.f32 %v2119_v58, %v835_v63 }
 0x1fa   : > { %v1464_v34 = vpop.eup %1463  ;;  %v1034_v33 = vsel %vm1033_vm0, %v1458_v22, %v1030_v51  ;;  %1471 = vpow2.f32 %v899_v45  ;;  %v837_v1 = vadd.f32 %v819_v3, %v2141_v23  ;;  %v838_v60 = vadd.f32 %v822_v24, %v2155_v19  ;;  %vm1018_vm4 = vmor %vm1016_vm15, %vm1017_vm1 }
 0x1fb   : > { %v1466_v35 = vpop.eup %1465  ;;  %v1039_v31 = vsel %vm2270_vm11, %v1038_v6, %v1034_v33  ;;  %v1015_v37 = vadd.f32 %v1462_v0, %v1014_v17  ;;  %vm1021_vm3 = vcmp.eq.f32.partialorder %v1020_v8, 8.507059e+37  ;;  %v2295_v30 = vadd.f32 1.0, %v1464_v34 }
 0x1fc   : > { %v1468_v39 = vpop.eup %1467  ;;  %1169 = vst.msk [vmem:[%s2185_s30 + $0x38] sm:$0xff] %vm1161_vm2, %v1039_v31  ;;  %v1023_v47 = vor.u32 1.1754944e-38, %v1022_v54  ;;  %v2302_v23 = vadd.f32 1.0, %v1466_v35  ;;  %v855_v19 = vadd.f32 %v2119_v58, %v837_v1  ;;  %v856_v57 = vadd.f32 %v2119_v58, %v838_v60 }
 0x1fd   : > { %v1019_v27 = vsel %vm1018_vm4, %v1462_v0, %v1015_v37  ;;  %v1042_v28 = vmul.f32 %v1468_v39, %v2274_v44  ;;  %1473 = vrcp.f32 %v2295_v30  ;;  %v869_v43 = vsub.f32 0.0, %v853_v16 }
 0x1fe   : > { %v1024_v10 = vsel %vm1021_vm3, %v1023_v47, %v1019_v27  ;;  %1475 = vrcp.f32 %v2302_v23  ;;  %vm1047_vm5 = vweird.f32 %v1468_v39  ;;  %v1050_v62 = vand.u32 2147483647, %v2274_v44 }
 0x1ff   : > { %v1470_v40 = vpop.eup %1469  ;;  %1168 = vst.msk [vmem:[%s2185_s30 + $0x30] sm:$0xff] %vm1161_vm2, %v1024_v10  ;;  %v1043_v25 = vsub.f32 1.0, %v1042_v28  ;;  %v1052_v41 = vand.u32 2147483648, %v2274_v44  ;;  %v1080_v26 = vand.u32 2147483647, %v2295_v30  ;;  %vm1046_vm6 = vweird.f32 %v2274_v44 }
 0x200   : > { %v1472_v4 = vpop.eup %1471  ;;  %v2313_v58 = vadd.f32 1.0, %v1470_v40  ;;  %v897_v9 = vmul.f32 1.442695, %v869_v43  ;;  %v1082_v38 = vand.u32 2147483648, %v2295_v30  ;;  %v1065_v21 = vand.u32 2147483647, %v2302_v23  ;;  %vm1048_vm7 = vmor %vm1046_vm6, %vm1047_vm5 }
 0x201   : > { %v1044_v14 = vmul.f32 %v1468_v39, %v1043_v25  ;;  %v2316_v20 = vadd.f32 1.0, %v1472_v4  ;;  %v1067_v49 = vand.u32 2147483648, %v2302_v23  ;;  %vm1051_vm8 = vcmp.eq.f32.partialorder %v1050_v62, 8.507059e+37 }
 0x202   : > { %1477 = vrcp.f32 %v2313_v58  ;;  %v1053_v22 = vor.u32 1.1754944e-38, %v1052_v41  ;;  %vm1076_vm9 = vweird.f32 %v2295_v30  ;;  %vm2327_vm10 = vcmp.eq.f32.partialorder %v1080_v26, 8.507059e+37 }
 0x203   : > { %v1474_v53 = vpop.eup %1473  ;;  %v1045_v18 = vadd.f32 %v1468_v39, %v1044_v14  ;;  %1479 = vrcp.f32 %v2316_v20  ;;  %vm1061_vm11 = vweird.f32 %v2302_v23  ;;  %v1083_v13 = vor.u32 1.1754944e-38, %v1082_v38 }
 0x204   : > { %v1072_v61 = vmul.f32 %v1474_v53, %v2295_v30  ;;  %v1476_v59 = vpop.eup %1475  ;;  %1481 = vpow2.f32 %v897_v9  ;;  %vm2335_vm12 = vcmp.eq.f32.partialorder %v1065_v21, 8.507059e+37  ;;  %v1068_v11 = vor.u32 1.1754944e-38, %v1067_v49 }
 0x205   : > { %v1049_v55 = vsel %vm1048_vm7, %v1468_v39, %v1045_v18  ;;  %v1057_v29 = vmul.f32 %v1476_v59, %v2302_v23  ;;  %v871_v5 = vsub.f32 0.0, %v855_v19  ;;  %v872_v0 = vsub.f32 0.0, %v856_v57 }
 0x206   : > { %v1054_v2 = vsel %vm1051_vm8, %v1053_v22, %v1049_v55  ;;  %v1073_v6 = vsub.f32 1.0, %v1072_v61  ;;  %vm1077_vm13 = vweird.f32 %v1474_v53  ;;  %v1095_v36 = vand.u32 2147483647, %v2313_v58 }
 0x207   : > { %1170 = vst.msk [vmem:[%s2185_s30 + $0x40] sm:$0xff] %vm1161_vm2, %v1054_v2  ;;  %v1058_v52 = vsub.f32 1.0, %v1057_v29  ;;  %v1097_v12 = vand.u32 2147483648, %v2313_v58  ;;  %v901_v56 = vmul.f32 1.442695, %v871_v5  ;;  %vm1062_vm14 = vweird.f32 %v1476_v59  ;;  %vm1078_vm15 = vmor %vm1076_vm9, %vm1077_vm13 }
 0x208   : > { %v1478_v48 = vpop.eup %1477  ;;  %v1074_v44 = vmul.f32 %v1474_v53, %v1073_v6  ;;  %v903_v15 = vmul.f32 1.442695, %v872_v0  ;;  %v1125_v51 = vand.u32 2147483647, %v2316_v20  ;;  %v1127_v54 = vand.u32 2147483648, %v2316_v20  ;;  %vm1063_vm0 = vmor %vm1061_vm11, %vm1062_vm14 }
 0x209   : > { %v1480_v32 = vpop.eup %1479  ;;  %v1087_v63 = vmul.f32 %v1478_v48, %v2313_v58  ;;  %v1059_v46 = vmul.f32 %v1476_v59, %v1058_v52  ;;  %1483 = vpow2.f32 %v901_v56  ;;  %vm1092_vm1 = vweird.f32 %v1478_v48 }
 0x20a   : > { %v1075_v8 = vadd.f32 %v1474_v53, %v1074_v44  ;;  %v1117_v3 = vmul.f32 %v1480_v32, %v2316_v20  ;;  %v1482_v24 = vpop.eup %1481  ;;  %1485 = vpow2.f32 %v903_v15  ;;  %vm1122_vm3 = vweird.f32 %v1480_v32 }
 0x20b   : > { %v1088_v50 = vsub.f32 1.0, %v1087_v63  ;;  %v1060_v17 = vadd.f32 %v1476_v59, %v1059_v46  ;;  %v917_v34 = vadd.f32 1.0, %v1482_v24  ;;  %vm1091_vm4 = vweird.f32 %v2313_v58 }
 0x20c   : > { %v1079_v45 = vsel %vm1078_vm15, %v1474_v53, %v1075_v8  ;;  %v1118_v16 = vsub.f32 1.0, %v1117_v3  ;;  %vm1093_vm5 = vmor %vm1091_vm4, %vm1092_vm1  ;;  %v1098_v30 = vor.u32 1.1754944e-38, %v1097_v12  ;;  %vm1121_vm6 = vweird.f32 %v2316_v20 }
 0x20d   : > { %v1084_v33 = vsel %vm2327_vm10, %v1083_v13, %v1079_v45  ;;  %v1089_v1 = vmul.f32 %v1478_v48, %v1088_v50  ;;  %v1064_v60 = vsel %vm1063_vm0, %v1476_v59, %v1060_v17  ;;  %1487 = vrcp.f32 %v917_v34  ;;  %vm1123_vm8 = vmor %vm1121_vm6, %vm1122_vm3 }
 0x20e   : > { %1172 = vst.msk [vmem:[%s2185_s30 + $0x50] sm:$0xff] %vm1161_vm2, %v1084_v33  ;;  %v1119_v35 = vmul.f32 %v1480_v32, %v1118_v16  ;;  %v1069_v31 = vsel %vm2335_vm12, %v1068_v11, %v1064_v60  ;;  %vm1096_vm7 = vcmp.eq.f32.partialorder %v1095_v36, 8.507059e+37  ;;  %v1128_v19 = vor.u32 1.1754944e-38, %v1127_v54 }
 0x20f   : > { %v1090_v37 = vadd.f32 %v1478_v48, %v1089_v1  ;;  %1171 = vst.msk [vmem:[%s2185_s30 + $0x48] sm:$0xff] %vm1161_vm2, %v1069_v31  ;;  %v1484_v47 = vpop.eup %1483  ;;  %vm1126_vm9 = vcmp.eq.f32.partialorder %v1125_v51, 8.507059e+37  ;;  %v1112_v41 = vand.u32 2147483648, %v917_v34  ;;  %v1110_v14 = vand.u32 2147483647, %v917_v34 }
 0x210   : > { %v1120_v39 = vadd.f32 %v1480_v32, %v1119_v35  ;;  %v919_v28 = vadd.f32 1.0, %v1484_v47  ;;  %v1486_v43 = vpop.eup %1485  ;;  %vm1106_vm11 = vweird.f32 %v917_v34 }
 0x211   : > { %v1094_v23 = vsel %vm1093_vm5, %v1478_v48, %v1090_v37  ;;  %v920_v4 = vadd.f32 1.0, %v1486_v43  ;;  %v1113_v38 = vor.u32 1.1754944e-38, %v1112_v41  ;;  %vm1111_vm13 = vcmp.eq.f32.partialorder %v1110_v14, 8.507059e+37 }
 0x212   : > { %v1099_v57 = vsel %vm1096_vm7, %v1098_v30, %v1094_v23  ;;  %v1124_v27 = vsel %vm1123_vm8, %v1480_v32, %v1120_v39  ;;  %1489 = vrcp.f32 %v919_v28  ;;  %v1142_v22 = vand.u32 2147483648, %v919_v28 }
 0x213   : > { %1173 = vst.msk [vmem:[%s2185_s30 + $0x58] sm:$0xff] %vm1161_vm2, %v1099_v57  ;;  %v1129_v10 = vsel %vm1126_vm9, %v1128_v19, %v1124_v27  ;;  %v1488_v40 = vpop.eup %1487  ;;  %1491 = vrcp.f32 %v920_v4  ;;  %v1140_v55 = vand.u32 2147483647, %v919_v28  ;;  %vm1136_vm15 = vweird.f32 %v919_v28 }
 0x214   : > { %1175 = vst.msk [vmem:[%s2185_s30 + $0x68] sm:$0xff] %vm1161_vm2, %v1129_v10  ;;  %v1102_v25 = vmul.f32 %v1488_v40, %v917_v34  ;;  %vm1107_vm10 = vweird.f32 %v1488_v40  ;;  %v1157_v6 = vand.u32 2147483648, %v920_v4  ;;  %v1143_v13 = vor.u32 1.1754944e-38, %v1142_v22 }
 0x215   : > { %vm1108_vm12 = vmor %vm1106_vm11, %vm1107_vm10  ;;  %v1155_v42 = vand.u32 2147483647, %v920_v4  ;;  %vm1141_vm3 = vcmp.eq.f32.partialorder %v1140_v55, 8.507059e+37  ;;  %vm1151_vm4 = vweird.f32 %v920_v4 }
 0x216   : > { %v1103_v62 = vsub.f32 1.0, %v1102_v25  ;;  %v1158_v48 = vor.u32 1.1754944e-38, %v1157_v6 }
 0x217   : > { %vm1156_vm6 = vcmp.eq.f32.partialorder %v1155_v42, 8.507059e+37 }
 0x218   : > { %v1104_v58 = vmul.f32 %v1488_v40, %v1103_v62  ;;  %v1490_v26 = vpop.eup %1489 }
 0x219   : > { %v1132_v9 = vmul.f32 %v1490_v26, %v919_v28  ;;  %v1492_v53 = vpop.eup %1491  ;;  %vm1137_vm14 = vweird.f32 %v1490_v26 }
 0x21a   : > { %v1105_v20 = vadd.f32 %v1488_v40, %v1104_v58  ;;  %v1147_v61 = vmul.f32 %v1492_v53, %v920_v4  ;;  %vm1138_vm0 = vmor %vm1136_vm15, %vm1137_vm14  ;;  %vm1152_vm1 = vweird.f32 %v1492_v53 }
 0x21b   : > { %v1133_v21 = vsub.f32 1.0, %v1132_v9  ;;  %vm1153_vm5 = vmor %vm1151_vm4, %vm1152_vm1 }
 0x21c   : > { %v1109_v18 = vsel %vm1108_vm12, %v1488_v40, %v1105_v20  ;;  %v1148_v7 = vsub.f32 1.0, %v1147_v61 }
 0x21d   : > { %v1114_v49 = vsel %vm1111_vm13, %v1113_v38, %v1109_v18  ;;  %v1134_v59 = vmul.f32 %v1490_v26, %v1133_v21 }
 0x21e   : > { %1174 = vst.msk [vmem:[%s2185_s30 + $0x60] sm:$0xff] %vm1161_vm2, %v1114_v49  ;;  %v1149_v29 = vmul.f32 %v1492_v53, %v1148_v7 }
 0x21f   : > { %v1135_v2 = vadd.f32 %v1490_v26, %v1134_v59 }
 0x220   : > { %v1150_v0 = vadd.f32 %v1492_v53, %v1149_v29 }
 0x221   : > { %v1139_v11 = vsel %vm1138_vm0, %v1490_v26, %v1135_v2 }
 0x222   : > { %v1144_v5 = vsel %vm1141_vm3, %v1143_v13, %v1139_v11  ;;  %v1154_v44 = vsel %vm1153_vm5, %v1492_v53, %v1150_v0 }
 0x223   : > { %1176 = vst.msk [vmem:[%s2185_s30 + $0x70] sm:$0xff] %vm1161_vm2, %v1144_v5  ;;  %v1159_v52 = vsel %vm1156_vm6, %v1158_v48, %v1154_v44 }
 0x224   : > { %1177 = vst.msk [vmem:[%s2185_s30 + $0x78] sm:$0xff] %vm1161_vm2, %v1159_v52 }
 0x225 PF: > { %s14_s14 = sadd.s32 1, %s1499_s14  }
 0x226   : > { %p11_p4 = scmp.ge.s32.totalorder %s14_s14, 4  }
 0x228   :  { %13 = sbr.rel (!%p11_p4) target bundleno = 2 (0x2), region = 65 }

</bundles_post_ra>
